<compile_context>
chip_gen: v7x
topology: tpu7x:2x2x1
jax: 0.10.0
libtpu: 0.0.40
codegen_flags: <defaults>
</compile_context>

<pallas_src>
import jax
import jax.numpy as jnp
from jax.experimental import pallas as pl
from jax.experimental.pallas import tpu as pltpu


def _round_up(x, m):
    return (x + m - 1) // m * m


def mf_kernel(users_ref, items_ref,          # scalar-prefetch (SMEM) index arrays
              user_emb_hbm, item_emb_hbm,    # full tables left in HBM (pl.ANY)
              bias_ref,                      # (1, TB) pre-summed bias, lane-dense
              scores_ref, row_reg_ref,       # (1, TB) lane-dense outputs
              u_buf, i_buf, sem):            # VMEM gather buffers + DMA semaphores
    tb, d = u_buf.shape
    base = pl.program_id(0) * tb

    # ---- fused gather: issue one row DMA per batch element (all in flight) ----
    def issue(r, carry):
        uid = users_ref[base + r]
        iid = items_ref[base + r]
        pltpu.make_async_copy(user_emb_hbm.at[pl.ds(uid, 1), :],
                              u_buf.at[pl.ds(r, 1), :], sem.at[0]).start()
        pltpu.make_async_copy(item_emb_hbm.at[pl.ds(iid, 1), :],
                              i_buf.at[pl.ds(r, 1), :], sem.at[1]).start()
        return carry

    jax.lax.fori_loop(0, tb, issue, 0)

    # ---- drain: each wait matches one issued row copy (same byte count) ----
    def drain(r, carry):
        pltpu.make_async_copy(user_emb_hbm.at[pl.ds(0, 1), :],
                              u_buf.at[pl.ds(0, 1), :], sem.at[0]).wait()
        pltpu.make_async_copy(item_emb_hbm.at[pl.ds(0, 1), :],
                              i_buf.at[pl.ds(0, 1), :], sem.at[1]).wait()
        return carry

    jax.lax.fori_loop(0, tb, drain, 0)

    u = u_buf[...]                                   # (TB, D) f32
    i = i_buf[...]                                   # (TB, D) f32

    dot = jnp.sum(u * i, axis=1)                     # (TB,)
    scores_ref[0, :] = jax.nn.sigmoid(dot + bias_ref[0, :])
    # Per-row ||u||^2 + ||i||^2; padded rows are sliced off in the wrapper.
    row_reg_ref[0, :] = jnp.sum(u * u + i * i, axis=1)


def mf_forward(users, items, params, *, max_tile=512):
    """MF forward: in-kernel embedding gather + dot + sigmoid + regularizer."""
    user_emb = params["user_emb"]
    item_emb = params["item_emb"]
    B = users.shape[0]
    D = user_emb.shape[1]

    users = users.astype(jnp.int32)
    items = items.astype(jnp.int32)

    # Tiny (4 B/row) bias gathers stay in the wrapper; pre-sum into ONE
    # lane-dense bias vector and compute their squared sums here.
    u_b = params["user_bias"][users][:, 0]           # (B,)
    i_b = params["item_bias"][items][:, 0]           # (B,)
    gb = params["global_bias"][0]
    bias = u_b + i_b + gb                            # (B,)
    bias_sq = jnp.sum(u_b * u_b) + jnp.sum(i_b * i_b)

    # Batch tiling: single full-width tile for small B, 128-aligned tiles after.
    if B <= max_tile:
        tb = _round_up(B, 8)
    else:
        tb = max_tile                                # multiple of 128
    num_tiles = pl.cdiv(B, tb)
    b_pad = num_tiles * tb
    pad = b_pad - B

    users_p = jnp.pad(users, (0, pad))               # pad with index 0 (valid row)
    items_p = jnp.pad(items, (0, pad))
    bias_p = jnp.pad(bias, (0, pad)).reshape(1, b_pad)

    grid_spec = pltpu.PrefetchScalarGridSpec(
        num_scalar_prefetch=2,                       # users, items -> SMEM
        grid=(num_tiles,),
        in_specs=[
            pl.BlockSpec(memory_space=pl.ANY),       # user_emb table (HBM)
            pl.BlockSpec(memory_space=pl.ANY),       # item_emb table (HBM)
            pl.BlockSpec((1, tb), lambda t, u, i: (0, t)),   # bias tile
        ],
        out_specs=[
            pl.BlockSpec((1, tb), lambda t, u, i: (0, t)),   # scores tile
            pl.BlockSpec((1, tb), lambda t, u, i: (0, t)),   # per-row reg tile
        ],
        scratch_shapes=[
            pltpu.VMEM((tb, D), jnp.float32),        # gathered user rows
            pltpu.VMEM((tb, D), jnp.float32),        # gathered item rows
            pltpu.SemaphoreType.DMA((2,)),
        ],
    )

    scores2d, row_reg2d = pl.pallas_call(
        mf_kernel,
        grid_spec=grid_spec,
        out_shape=(
            jax.ShapeDtypeStruct((1, b_pad), jnp.float32),
            jax.ShapeDtypeStruct((1, b_pad), jnp.float32),
        ),
        compiler_params=pltpu.CompilerParams(
            dimension_semantics=("parallel",),       # tiles independent -> megacore
            vmem_limit_bytes=32 * 1024 * 1024,       # safe on v5e/v6e/v7x
        ),
    )(users_p, items_p, user_emb, item_emb, bias_p)

    scores = scores2d[0, :B]
    reg = (jnp.sum(row_reg2d[0, :B]) + bias_sq) / B  # divide by GLOBAL batch size
    return scores, reg


def init_params(key, n_users, n_items, emb_dim, stddev=0.1):
    ku, ki = jax.random.split(key)
    return {
        "user_emb": stddev * jax.random.normal(ku, (n_users, emb_dim), jnp.float32),
        "item_emb": stddev * jax.random.normal(ki, (n_items, emb_dim), jnp.float32),
        "user_bias": jnp.zeros((n_users, 1), jnp.float32),
        "item_bias": jnp.zeros((n_items, 1), jnp.float32),
        "global_bias": jnp.zeros((1,), jnp.float32),
    }


def mf_forward_ref(users, items, params):
    """Pure-JAX reference mirroring the PyTorch forward."""
    u_emb = params["user_emb"][users]
    i_emb = params["item_emb"][items]
    u_bias = params["user_bias"][users]
    i_bias = params["item_bias"][items]
    gb = params["global_bias"]
    scores = jax.nn.sigmoid(
        jnp.sum(u_emb * i_emb, axis=1) + u_bias[:, 0] + i_bias[:, 0] + gb[0]
    )
    reg = ((u_emb ** 2).sum() + (i_emb ** 2).sum()
           + (u_bias ** 2).sum() + (i_bias ** 2).sum()) / u_emb.shape[0]
    return scores, reg


if __name__ == "__main__":
    n_users, n_items, emb_dim = 50, 100, 32

    key = jax.random.PRNGKey(0)
    kp, kub, kib, ku, ki = jax.random.split(key, 5)
    params = init_params(kp, n_users, n_items, emb_dim, stddev=0.1)
    # Non-zero biases so the bias path is actually exercised by the check.
    params["user_bias"] = 0.02 * jax.random.normal(kub, (n_users, 1), jnp.float32)
    params["item_bias"] = 0.02 * jax.random.normal(kib, (n_items, 1), jnp.float32)
    params["global_bias"] = jnp.array([0.05], jnp.float32)

    # Small batch, not a multiple of 8 (exercises tail padding, single tile).
    users = jax.random.randint(ku, (10,), 0, n_users, dtype=jnp.int32)
    items = jax.random.randint(ki, (10,), 0, n_items, dtype=jnp.int32)

    scores, reg = jax.block_until_ready(mf_forward(users, items, params))
    s_ref, r_ref = mf_forward_ref(users, items, params)
    assert scores.shape == (10,)
    assert jnp.allclose(scores, s_ref, atol=1e-5, rtol=1e-5)
    assert jnp.allclose(reg, r_ref, atol=1e-5, rtol=1e-5)

    # Multi-tile path (grid > 1, 128-aligned tiles, padded last tile).
    ku2, ki2 = jax.random.split(jax.random.PRNGKey(1))
    users2 = jax.random.randint(ku2, (300,), 0, n_users, dtype=jnp.int32)
    items2 = jax.random.randint(ki2, (300,), 0, n_items, dtype=jnp.int32)
    scores2, reg2 = jax.block_until_ready(
        mf_forward(users2, items2, params, max_tile=128))
    s2_ref, r2_ref = mf_forward_ref(users2, items2, params)
    assert scores2.shape == (300,)
    assert jnp.allclose(scores2, s2_ref, atol=1e-5, rtol=1e-5)
    assert jnp.allclose(reg2, r2_ref, atol=1e-5, rtol=1e-5)

    print("KERNEL_OK")
</pallas_src>

<mosaic_0001>
module attributes {stable_mosaic.version = 11 : i64} {
  func.func @mf_kernel(%arg0: i32, %arg1: memref<16xi32, #tpu.memory_space<smem>>, %arg2: memref<16xi32, #tpu.memory_space<smem>>, %arg3: memref<50x32xf32, #tpu.memory_space<any>>, %arg4: memref<100x32xf32, #tpu.memory_space<any>>, %arg5: memref<1x16xf32, #tpu.memory_space<vmem>>, %arg6: memref<1x16xf32, #tpu.memory_space<vmem>>, %arg7: memref<1x16xf32, #tpu.memory_space<vmem>>, %arg8: memref<16x32xf32, #tpu.memory_space<vmem>>, %arg9: memref<16x32xf32, #tpu.memory_space<vmem>>, %arg10: memref<2x!tpu.dma_semaphore, #tpu.memory_space<semaphore_mem>>) attributes {dimension_semantics = [#tpu.dimension_semantics<parallel>], iteration_bounds = array<i64: 1>, scalar_prefetch = 2 : i64, scratch_operands = 3 : i64, tpu.core_type = #tpu.core_type<tc>, window_params = [{}, {}, {transform_indices = @transform_2, window_bounds = array<i64: 1, 16>}, {transform_indices = @transform_3, window_bounds = array<i64: 1, 16>}, {transform_indices = @transform_4, window_bounds = array<i64: 1, 16>}]} {
    %c16_i32 = arith.constant 16 : i32
    %0 = arith.muli %arg0, %c16_i32 : i32
    %c0_i32 = arith.constant 0 : i32
    %c16_i32_0 = arith.constant 16 : i32
    %1 = arith.addi %c0_i32, %c16_i32_0 : i32
    %c1_i32 = arith.constant 1 : i32
    scf.for %arg11 = %c0_i32 to %1 step %c1_i32  : i32 {
      %25 = arith.addi %0, %arg11 : i32
      %26 = arith.index_cast %25 : i32 to index
      %27 = memref.load %arg1[%26] : memref<16xi32, #tpu.memory_space<smem>>
      %28 = arith.addi %0, %arg11 : i32
      %29 = arith.index_cast %28 : i32 to index
      %30 = memref.load %arg2[%29] : memref<16xi32, #tpu.memory_space<smem>>
      %c0_i32_16 = arith.constant 0 : i32
      %c0_i32_17 = arith.constant 0 : i32
      %31 = tpu.memref_slice %arg3[%27, %c0_i32_17] : memref<50x32xf32, #tpu.memory_space<any>> -> memref<1x32xf32, #tpu.memory_space<any>>
      %c0_i32_18 = arith.constant 0 : i32
      %32 = tpu.memref_slice %arg8[%arg11, %c0_i32_18] : memref<16x32xf32, #tpu.memory_space<vmem>> -> memref<1x32xf32, #tpu.memory_space<vmem>>
      %33 = tpu.memref_slice %arg10[%c0_i32_16] : memref<2x!tpu.dma_semaphore, #tpu.memory_space<semaphore_mem>> -> memref<1x!tpu.dma_semaphore, #tpu.memory_space<semaphore_mem>>
      %34 = tpu.memref_squeeze %33 : memref<1x!tpu.dma_semaphore, #tpu.memory_space<semaphore_mem>> -> memref<!tpu.dma_semaphore, #tpu.memory_space<semaphore_mem>>
      tpu.enqueue_dma source(%31 : memref<1x32xf32, #tpu.memory_space<any>>) target(%32 : memref<1x32xf32, #tpu.memory_space<vmem>>) target_semaphore(%34 : memref<!tpu.dma_semaphore, #tpu.memory_space<semaphore_mem>>)
      %c1_i32_19 = arith.constant 1 : i32
      %c0_i32_20 = arith.constant 0 : i32
      %35 = tpu.memref_slice %arg4[%30, %c0_i32_20] : memref<100x32xf32, #tpu.memory_space<any>> -> memref<1x32xf32, #tpu.memory_space<any>>
      %c0_i32_21 = arith.constant 0 : i32
      %36 = tpu.memref_slice %arg9[%arg11, %c0_i32_21] : memref<16x32xf32, #tpu.memory_space<vmem>> -> memref<1x32xf32, #tpu.memory_space<vmem>>
      %37 = tpu.memref_slice %arg10[%c1_i32_19] : memref<2x!tpu.dma_semaphore, #tpu.memory_space<semaphore_mem>> -> memref<1x!tpu.dma_semaphore, #tpu.memory_space<semaphore_mem>>
      %38 = tpu.memref_squeeze %37 : memref<1x!tpu.dma_semaphore, #tpu.memory_space<semaphore_mem>> -> memref<!tpu.dma_semaphore, #tpu.memory_space<semaphore_mem>>
      tpu.enqueue_dma source(%35 : memref<1x32xf32, #tpu.memory_space<any>>) target(%36 : memref<1x32xf32, #tpu.memory_space<vmem>>) target_semaphore(%38 : memref<!tpu.dma_semaphore, #tpu.memory_space<semaphore_mem>>)
    }
    %c16_i32_1 = arith.constant 16 : i32
    %c0_i32_2 = arith.constant 0 : i32
    %c16_i32_3 = arith.constant 16 : i32
    %2 = arith.addi %c0_i32_2, %c16_i32_3 : i32
    %c1_i32_4 = arith.constant 1 : i32
    scf.for %arg11 = %c0_i32_2 to %2 step %c1_i32_4  : i32 {
      %c0_i32_16 = arith.constant 0 : i32
      %c0_i32_17 = arith.constant 0 : i32
      %c0_i32_18 = arith.constant 0 : i32
      %25 = tpu.memref_slice %arg3[%c0_i32_17, %c0_i32_18] : memref<50x32xf32, #tpu.memory_space<any>> -> memref<1x32xf32, #tpu.memory_space<any>>
      %c0_i32_19 = arith.constant 0 : i32
      %c0_i32_20 = arith.constant 0 : i32
      %26 = tpu.memref_slice %arg8[%c0_i32_19, %c0_i32_20] : memref<16x32xf32, #tpu.memory_space<vmem>> -> memref<1x32xf32, #tpu.memory_space<vmem>>
      %27 = tpu.memref_slice %arg10[%c0_i32_16] : memref<2x!tpu.dma_semaphore, #tpu.memory_space<semaphore_mem>> -> memref<1x!tpu.dma_semaphore, #tpu.memory_space<semaphore_mem>>
      %28 = tpu.memref_squeeze %27 : memref<1x!tpu.dma_semaphore, #tpu.memory_space<semaphore_mem>> -> memref<!tpu.dma_semaphore, #tpu.memory_space<semaphore_mem>>
      tpu.wait_dma2 semaphore(%28 : memref<!tpu.dma_semaphore, #tpu.memory_space<semaphore_mem>>) src(%25 : memref<1x32xf32, #tpu.memory_space<any>>) dst(%26 : memref<1x32xf32, #tpu.memory_space<vmem>>)
      %c1_i32_21 = arith.constant 1 : i32
      %c0_i32_22 = arith.constant 0 : i32
      %c0_i32_23 = arith.constant 0 : i32
      %29 = tpu.memref_slice %arg4[%c0_i32_22, %c0_i32_23] : memref<100x32xf32, #tpu.memory_space<any>> -> memref<1x32xf32, #tpu.memory_space<any>>
      %c0_i32_24 = arith.constant 0 : i32
      %c0_i32_25 = arith.constant 0 : i32
      %30 = tpu.memref_slice %arg9[%c0_i32_24, %c0_i32_25] : memref<16x32xf32, #tpu.memory_space<vmem>> -> memref<1x32xf32, #tpu.memory_space<vmem>>
      %31 = tpu.memref_slice %arg10[%c1_i32_21] : memref<2x!tpu.dma_semaphore, #tpu.memory_space<semaphore_mem>> -> memref<1x!tpu.dma_semaphore, #tpu.memory_space<semaphore_mem>>
      %32 = tpu.memref_squeeze %31 : memref<1x!tpu.dma_semaphore, #tpu.memory_space<semaphore_mem>> -> memref<!tpu.dma_semaphore, #tpu.memory_space<semaphore_mem>>
      tpu.wait_dma2 semaphore(%32 : memref<!tpu.dma_semaphore, #tpu.memory_space<semaphore_mem>>) src(%29 : memref<1x32xf32, #tpu.memory_space<any>>) dst(%30 : memref<1x32xf32, #tpu.memory_space<vmem>>)
    }
    %c0 = arith.constant 0 : index
    %c0_5 = arith.constant 0 : index
    %3 = vector.load %arg8[%c0, %c0_5] : memref<16x32xf32, #tpu.memory_space<vmem>>, vector<16x32xf32>
    %c0_6 = arith.constant 0 : index
    %c0_7 = arith.constant 0 : index
    %4 = vector.load %arg9[%c0_6, %c0_7] : memref<16x32xf32, #tpu.memory_space<vmem>>, vector<16x32xf32>
    %5 = arith.mulf %3, %4 : vector<16x32xf32>
    %cst = arith.constant dense<0.000000e+00> : vector<16xf32>
    %6 = vector.multi_reduction <add>, %5, %cst [1] : vector<16x32xf32> to vector<16xf32>
    %c0_8 = arith.constant 0 : index
    %c0_9 = arith.constant 0 : index
    %7 = vector.load %arg5[%c0_8, %c0_9] : memref<1x16xf32, #tpu.memory_space<vmem>>, vector<1x16xf32>
    %8 = vector.shape_cast %7 : vector<1x16xf32> to vector<16xf32>
    %9 = arith.addf %6, %8 : vector<16xf32>
    %10 = arith.negf %9 : vector<16xf32>
    %11 = math.exp %10 : vector<16xf32>
    %cst_10 = arith.constant 1.000000e+00 : f32
    %12 = vector.broadcast %cst_10 : f32 to vector<16xf32>
    %13 = arith.addf %12, %11 : vector<16xf32>
    %14 = arith.divf %12, %13 : vector<16xf32>
    %c0_11 = arith.constant 0 : index
    %c0_12 = arith.constant 0 : index
    %15 = vector.load %arg6[%c0_11, %c0_12] : memref<1x16xf32, #tpu.memory_space<vmem>>, vector<1x16xf32>
    %16 = vector.shape_cast %15 : vector<1x16xf32> to vector<16xf32>
    %17 = vector.shape_cast %14 : vector<16xf32> to vector<1x16xf32>
    tpu.vector_store %arg6[%c0_11, %c0_12], %17 {strides = array<i32>} : memref<1x16xf32, #tpu.memory_space<vmem>>, vector<1x16xf32>,
    %18 = arith.mulf %3, %3 : vector<16x32xf32>
    %19 = arith.mulf %4, %4 : vector<16x32xf32>
    %20 = arith.addf %18, %19 : vector<16x32xf32>
    %cst_13 = arith.constant dense<0.000000e+00> : vector<16xf32>
    %21 = vector.multi_reduction <add>, %20, %cst_13 [1] : vector<16x32xf32> to vector<16xf32>
    %c0_14 = arith.constant 0 : index
    %c0_15 = arith.constant 0 : index
    %22 = vector.load %arg7[%c0_14, %c0_15] : memref<1x16xf32, #tpu.memory_space<vmem>>, vector<1x16xf32>
    %23 = vector.shape_cast %22 : vector<1x16xf32> to vector<16xf32>
    %24 = vector.shape_cast %21 : vector<16xf32> to vector<1x16xf32>
    tpu.vector_store %arg7[%c0_14, %c0_15], %24 {strides = array<i32>} : memref<1x16xf32, #tpu.memory_space<vmem>>, vector<1x16xf32>,
    return
  }
  func.func @transform_2(%arg0: i32, %arg1: memref<16xi32, #tpu.memory_space<smem>>, %arg2: memref<16xi32, #tpu.memory_space<smem>>) -> (i32, i32) {
    %c0_i32 = arith.constant 0 : i32
    %c0_i32_0 = arith.constant 0 : i32
    return %c0_i32, %arg0 : i32, i32
  }
  func.func @transform_3(%arg0: i32, %arg1: memref<16xi32, #tpu.memory_space<smem>>, %arg2: memref<16xi32, #tpu.memory_space<smem>>) -> (i32, i32) {
    %c0_i32 = arith.constant 0 : i32
    %c0_i32_0 = arith.constant 0 : i32
    return %c0_i32, %arg0 : i32, i32
  }
  func.func @transform_4(%arg0: i32, %arg1: memref<16xi32, #tpu.memory_space<smem>>, %arg2: memref<16xi32, #tpu.memory_space<smem>>) -> (i32, i32) {
    %c0_i32 = arith.constant 0 : i32
    %c0_i32_0 = arith.constant 0 : i32
    return %c0_i32, %arg0 : i32, i32
  }
}

</mosaic_0001>

<bundles_post_ra>
// kernel: tpu_custom_call.1
= control target key start
LH: loop header
LB: loop body
LE: loop exit
PB: predicated region body
PF: predicated region fallthrough
CT: control target
= control target key end

     0   :  { %s524_s0 = inlined_call_operand.vmem [shape: s32[16], index: 0, kind: input, shape index: {}]   ;;  %s525_s2 = inlined_call_operand.vmem [shape: f32[50,32], index: 2, kind: input, shape index: {}]   ;;  %s526_s3 = inlined_call_operand.vmem [shape: f32[100,32], index: 3, kind: input, shape index: {}]   ;;  %s527_s4 = inlined_call_operand.vmem [shape: f32[1,16], index: 4, kind: input, shape index: {}]   ;;  %s528_s5 = inlined_call_operand.hbm [shape: f32[1,16], index: 5, kind: output, shape index: {0}]   ;;  %s529_s6 = inlined_call_operand.hbm [shape: f32[1,16], index: 6, kind: output, shape index: {1}]   ;;  %s530_s1 = inlined_call_operand.vmem [shape: s32[16], index: 1, kind: input, shape index: {}]  }
   0x1   :  { %s12_s23 = sshll.u32 %s524_s0, 4  ;;  %s16_s26 = sshll.u32 %s530_s1, 4  ;;  %s13_s23 = int_to_ptr.vmem [resolvable:$true] %s12_s23  ;;  %s17_s26 = int_to_ptr.vmem [resolvable:$true] %s16_s26 }
   0x2   :  { %s343_s27 = scalar_lea.vmem %s13_s23, 16  ;;  %p348_p1 = scmp.lt.s32.totalorder %s13_s23, %s13_s23 }
   0x3   :  { %p344_p0 = scmp.ne.s32.totalorder %s13_s23, %s343_s27  ;;  %p349_p2 = scmp.lt.s32.totalorder %s343_s27, %s343_s27 }
   0x5   :  { %p350_p3 = por %p349_p2, %p348_p1 }
   0x7   :  { %p351_p4 = pnand %p350_p3, %p344_p0 }
   0x9   :  { %354 = shalt.err (!%p351_p4)  }
   0xa   :  { %s437_s28 = smov [#allocation6]   ;;  %s355_s29 = scalar_lea.vmem %s17_s26, 16 }
   0xb   :  { %15 = dma.vmem_to_smem %s13_s23, 16, %s437_s28, [#allocation5] }
   0xc   :  { %p356_p5 = scmp.ne.s32.totalorder %s17_s26, %s355_s29  ;;  %p360_p6 = scmp.lt.s32.totalorder %s17_s26, %s17_s26 }
   0xd   :  { %p361_p7 = scmp.lt.s32.totalorder %s355_s29, %s355_s29 }
   0xf   :  { %p362_p8 = por %p361_p7, %p360_p6 }
  0x11   :  { %p363_p9 = pnand %p362_p8, %p356_p5 }
  0x13   :  { %366 = shalt.err (!%p363_p9)  }
  0x14   :  { %s438_s0 = smov [#allocation7]  }
  0x15   :  { %19 = dma.vmem_to_smem %s17_s26, 16, %s438_s0, [#allocation5] }
  0x16   :  { %419 = dma.done.wait [#allocation5], 32 }
  0x17   :  { %420 = vsyncadd [#allocation5], 4294967264 }
  0x18   :  { %21 = sfence }
  0x19   :  { %22 = vsyncpa [#allocation9], 0 }
  0x1a   :  { %23 = vsyncpa [#allocation11], 0  ;;  %s429_s1 = smov 0  }
  0x1b LB: > { %s34_s30 = sld [smem:[#allocation6 + %s431_s1]]  ;;  %s37_s11 = scalar_lea.vmem [#allocation2], %s431_s1  ;;  %s431_s1 = sphi %s429_s1, %s32_s1  }
  0x1c   : > { %s35_s7 = sld [smem:[#allocation7 + %s431_s1]] }
  0x21   : > { %s36_s10 = scalar_lea.vmem %s525_s2, %s34_s30 }
  0x22   : > { %v55_v0 = vld [vmem:[%s36_s10] sm:$0x1] }
  0x23   : > { %56 = vst [vmem:[%s37_s11] sm:$0x1] %v55_v0 }
  0x24   : > { %81 = vsyncadd [#allocation4], 16  ;;  %s82_s14 = scalar_lea.vmem %s526_s3, %s35_s7  ;;  %s83_s15 = scalar_lea.vmem [#allocation3], %s431_s1 }
  0x25   : > { %v102_v1 = vld [vmem:[%s82_s14] sm:$0x1] }
  0x26   : > { %103 = vst [vmem:[%s83_s15] sm:$0x1] %v102_v1 }
  0x27   : > { %128 = vsyncadd [#allocation4 + $0x1], 16  ;;  %s32_s1 = sadd.s32 1, %s431_s1  }
  0x28   : > { %p29_p10 = scmp.ge.s32.totalorder %s32_s1, 16  }
  0x29   :  { %s433_s16 = smov (%p29_p10), 0  }
  0x2a   :  { %31 = sbr.rel (!%p29_p10) target bundleno = 27 (0x1b), region = 133 }
  0x31 LB: > { %421 = dma.done.wait [#allocation4], 16  ;;  %s435_s16 = sphi %s433_s16, %s134_s16  }
  0x32   : > { %422 = vsyncadd [#allocation4], 4294967280 }
  0x33   : > { %423 = dma.done.wait [#allocation4 + $0x1], 16 }
  0x34   : > { %424 = vsyncadd [#allocation4 + $0x1], 4294967280  ;;  %s134_s16 = sadd.s32 1, %s435_s16  }
  0x35   : > { %p131_p11 = scmp.ge.s32.totalorder %s134_s16, 16  }
  0x36   :  { %v141_v2 = vld [vmem:[#allocation2] sm:$0xff] (%p131_p11)  ;;  %v143_v3 = vld [vmem:[#allocation3] sm:$0xff] (%p131_p11)  ;;  %vm147_vm0 = vcmask (%p131_p11), 261120   ;;  %v142_v4 = vld [vmem:[#allocation2 + $0x8] sm:$0xff] (%p131_p11)  ;;  %v439_v19 = vmov (%p131_p11), 0   ;;  %v191_v32 = vlaneseq (%p131_p11)  ;;  %s440_s2 = smov (%p131_p11), [#allocation10]  }
  0x37   :  { %133 = sbr.rel (!%p131_p11) target bundleno = 49 (0x31), region = 144  ;;  %v145_v5 = vmul.f32 (%p131_p11), %v143_v3, %v141_v2  ;;  %v144_v6 = vld [vmem:[#allocation3 + $0x8] sm:$0xff] (%p131_p11)  ;;  %v307_v7 = vld [vmem:[%s527_s4] ss:$0 sm:$0xff] (%p131_p11)  ;;  %v207_v11 = vmul.f32 (%p131_p11), %v141_v2, %v141_v2  ;;  %v209_v12 = vmul.f32 (%p131_p11), %v143_v3, %v143_v3  ;;  %v208_v15 = vmul.f32 (%p131_p11), %v142_v4, %v142_v4  ;;  %333 = vset.pattern.permute.xlu0 (%p131_p11), %v439_v19  ;;  %s248_s3 = sshll.u32 (%p131_p11), %s440_s2, 4  ;;  %s249_s3 = int_to_ptr.vmem [resolvable:$true] %s248_s3 }
  0x38   :  { %v146_v8 = vmul.f32 (%p131_p11), %v144_v6, %v142_v4  ;;  %161 = vbcast.lane.b32.xlu1 (%p131_p11), %v307_v7, 256  ;;  %v210_v16 = vmul.f32 (%p131_p11), %v144_v6, %v144_v6  ;;  %v192_v33 = vand.u32 (%p131_p11), 127, %v191_v32  ;;  %v194_v35 = vshrl.u32 (%p131_p11), %v191_v32, 7  ;;  %s367_s4 = scalar_lea.vmem (%p131_p11), %s249_s3, 16  ;;  %s371_s19 = scalar_lea.vmem (%p131_p11), %s249_s3, 32 }
  0x39   :  { %v148_v9 = vsel (%p131_p11), %vm147_vm0, %v145_v5, 0.0  ;;  %v211_v13 = vadd.f32 (%p131_p11), %v209_v12, %v207_v11  ;;  %334 = vset.pattern.permute.xlu1 (%p131_p11), %v439_v19  ;;  %vm202_vm1 = vcmask (%p131_p11), 130112   ;;  %vm205_vm2 = vcmask (%p131_p11), 122880   ;;  %p368_p12 = scmp.ne.s32.totalorder (%p131_p11), %s249_s3, %s367_s4  ;;  %p372_p13 = scmp.lt.s32.totalorder (%p131_p11), %s249_s3, %s249_s3 }
  0x3a   :  { %149 = vadd.xlane.f32.xlu0 (%p131_p11), %v148_v9  ;;  %v151_v10 = vsel (%p131_p11), %vm147_vm0, %v146_v8, 0.0  ;;  %v212_v17 = vadd.f32 (%p131_p11), %v210_v16, %v208_v15  ;;  %v197_v36 = vadd.s32 (%p131_p11), 4294967288, %v192_v33  ;;  %v195_v38 = vsub.s32 (%p131_p11), %v192_v33, %v194_v35  ;;  %p373_p0 = scmp.lt.s32.totalorder (%p131_p11), %s371_s19, %s367_s4 }
  0x3b   :  { %v213_v14 = vsel (%p131_p11), %vm147_vm0, %v211_v13, 0.0 }
  0x3c   :  { %165 = vbcast.lane.b32.xlu1 (%p131_p11), %v307_v7, 264  ;;  %v216_v18 = vsel (%p131_p11), %vm147_vm0, %v212_v17, 0.0  ;;  %v200_v40 = vsub.s32 (%p131_p11), %v197_v36, %v194_v35  ;;  %p374_p1 = por (%p131_p11), %p373_p0, %p372_p13 }
  0x3e   :  { %152 = vadd.xlane.f32.xlu0 %v151_v10  ;;  %p375_p2 = pnand %p374_p1, %p368_p12 }
  0x42   :  { %214 = vadd.xlane.f32.xlu0 %v213_v14 }
  0x60   :  { %217 = vadd.xlane.f32.xlu1 %v216_v18 }
  0xaa   :  { %v162_v20 = vpop.permute.xlu1 %161 }
  0xae   :  { %v166_v23 = vpop.permute.xlu1 %165 }
  0xc7   :  { %v150_v21 = vpop.xlane.xlu0 %149 }
  0xc8   :  { %v169_v22 = vadd.f32 %v162_v20, %v150_v21 }
  0xca   :  { %v308_v24 = vmul.f32 -1.442695, %v169_v22 }
  0xcb   :  { %v153_v25 = vpop.xlane.xlu0 %152 }
  0xcc   :  { %335 = vpow2.f32 %v308_v24  ;;  %v170_v26 = vadd.f32 %v166_v23, %v153_v25 }
  0xce   :  { %v309_v27 = vmul.f32 -1.442695, %v170_v26 }
  0xcf   :  { %v215_v39 = vpop.xlane.xlu0 %214 }
  0xd0   :  { %337 = vpow2.f32 %v309_v27  ;;  %v224_v41 = vrot.slane %v215_v39, %v195_v38 }
  0xd6   :  { %v336_v28 = vpop.eup %335 }
  0xd7   :  { %v177_v29 = vadd.f32 1.0, %v336_v28 }
  0xd9   :  { %339 = vrcp.f32 %v177_v29 }
  0xda   :  { %v338_v30 = vpop.eup %337 }
  0xdb   :  { %v178_v31 = vadd.f32 1.0, %v338_v30 }
  0xdd   :  { %341 = vrcp.f32 %v178_v31 }
  0xe3   :  { %v340_v34 = vpop.eup %339 }
  0xe4   :  { %186 = vperm.xlu0 %333, %v340_v34  }
  0xe7   :  { %v342_v37 = vpop.eup %341 }
  0xe8   :  { %189 = vperm.xlu1 %334, %v342_v37  }
  0xed   :  { %v218_v42 = vpop.xlane.xlu1 %217 }
  0xee   :  { %v228_v43 = vrot.slane %v218_v42, %v200_v40 }
  0xf0   :  { %v229_v44 = vsel %vm202_vm1, %v228_v43, %v224_v41 }
  0xf1   :  { %231 = vst.msk [vmem:[#allocation10] sm:$0x1] %vm205_vm2, %v229_v44 }
  0xf2   :  { %378 = shalt.err (!%p375_p2)
}
  0xf3   :  { %s379_s22 = scalar_lea.hbm %s529_s6, 16 }
  0xf4   :  { %p380_p3 = scmp.ne.s32.totalorder %s529_s6, %s379_s22  ;;  %p383_p4 = scmp.lt.u32.totalorder %s379_s22, %s529_s6 }
  0xf6   :  { %p385_p5 = pnand %p383_p4, %p380_p3 }
  0xf8   :  { %388 = shalt.err (!%p385_p5)
}
  0xf9   :  { %251 = dma.vmem_to_hbm [thread:$0]  %s249_s3, 16, %s529_s6, [#allocation11]  }
  0xfa   :  { %s441_s29 = smov [#allocation8]  }
  0xfb   :  { %s238_s0 = sshll.u32 %s441_s29, 4  ;;  %s239_s0 = int_to_ptr.vmem [resolvable:$true] %s238_s0 }
  0xfc   :  { %s389_s1 = scalar_lea.vmem %s239_s0, 16  ;;  %s393_s30 = scalar_lea.vmem %s239_s0, 32 }
  0xfd   :  { %p390_p6 = scmp.ne.s32.totalorder %s239_s0, %s389_s1  ;;  %p394_p7 = scmp.lt.s32.totalorder %s239_s0, %s239_s0 }
  0xfe   :  { %p395_p8 = scmp.lt.s32.totalorder %s393_s30, %s389_s1 }
 0x100   :  { %p396_p9 = por %p395_p8, %p394_p7 }
 0x102   :  { %p397_p10 = pnand %p396_p9, %p390_p6 }
 0x163   :  { %v187_v45 = vpop.permute.xlu0 %186 }
 0x164   :  { %v196_v47 = vrot.slane %v187_v45, %v195_v38 }
 0x167   :  { %v190_v46 = vpop.permute.xlu1 %189 }
 0x168   :  { %v201_v48 = vrot.slane %v190_v46, %v200_v40 }
 0x16a   :  { %v203_v49 = vsel %vm202_vm1, %v201_v48, %v196_v47 }
 0x16b   :  { %206 = vst.msk [vmem:[#allocation8] sm:$0x1] %vm205_vm2, %v203_v49 }
 0x16c   :  { %400 = shalt.err (!%p397_p10)
}
 0x16d   :  { %s401_s8 = scalar_lea.hbm %s528_s5, 16 }
 0x16e   :  { %p402_p11 = scmp.ne.s32.totalorder %s528_s5, %s401_s8  ;;  %p405_p12 = scmp.lt.u32.totalorder %s401_s8, %s528_s5 }
 0x170   :  { %p407_p13 = pnand %p405_p12, %p402_p11 }
 0x172   :  { %410 = shalt.err (!%p407_p13)
}
 0x173   :  { %241 = dma.vmem_to_hbm [thread:$0]  %s239_s0, 16, %s528_s5, [#allocation9]  }
 0x174   :  { %425 = dma.done.wait [#allocation9], 16  }
 0x175   :  { %426 = vsyncadd [#allocation9], 4294967280 }
 0x176   :  { %427 = dma.done.wait [#allocation11], 16  }
 0x177   :  { %428 = vsyncadd [#allocation11], 4294967280 }
 0x178   :  { %258 = vsyncpa [#allocation9], 1 }
 0x179   :  { %259 = vsyncpa [#allocation11], 1 }
 0x17a   :  { %260 = vsyncmov [#allocation4] }
 0x17d   :  { %s261_s15 = vpop.sfrf %260 }
 0x17e   :  { %p310_p0 = scmp.ne.s32.totalorder %s261_s15, 0 }
 0x180   :  { %265 = shalt.err (%p310_p0)  }
 0x181   :  { %267 = vsyncmov [#allocation4 + $0x1] }
 0x184   :  { %s268_s16 = vpop.sfrf %267 }
 0x185   :  { %p311_p1 = scmp.ne.s32.totalorder %s268_s16, 0 }
 0x187   :  { %272 = shalt.err (%p311_p1)  }

</bundles_post_ra>
